<compile_context>
chip_gen: v6e
topology: v6e:2x2x1
jax: 0.10.0
libtpu: 0.0.40
codegen_flags: <defaults>
</compile_context>

<pallas_src>
import jax
import jax.numpy as jnp
from jax.experimental import pallas as pl
from jax.experimental.pallas import tpu as pltpu

LANE = 128                           # f32 lane width
MAX_TILE_B = 32768                   # batch-tile cap (lanes), ~16 MiB working set
VMEM_LIMIT_BYTES = 48 * 1024 * 1024  # raise scoped VMEM (v5e default is 16 MiB)


def mlp_kernel(x_ref, w1_ref, b1_ref, w2_ref, b2_ref, w3_ref, b3_ref, o_ref):
    x = x_ref[...]                                        # (7, TB), batch on lanes

    # fc1: (32,7) @ (7,TB) on the MXU (K=7 pads to 128; MXU slot is idle anyway).
    h1 = jnp.dot(w1_ref[...], x, preferred_element_type=jnp.float32)
    h1 = jnp.maximum(h1 + b1_ref[...], 0.0)               # (32, TB)

    # fc2: (64,32) @ (32,TB) on the MXU.
    h2 = jnp.dot(w2_ref[...], h1, preferred_element_type=jnp.float32)
    h2 = jnp.maximum(h2 + b2_ref[...], 0.0)               # (64, TB)

    # fc3: (2,64) @ (64,TB) on the MXU (replaces VPU mults + sublane reductions).
    z = jnp.dot(w3_ref[...], h2, preferred_element_type=jnp.float32) + b3_ref[...]

    # Sigmoid epilogue: exp lands on the EUP; approx reciprocal also on the EUP.
    # exp(-z) may overflow to inf for very negative z -> 1/(1+inf) = 0.0 (no NaN).
    o_ref[...] = pl.reciprocal(1.0 + jnp.exp(-z), approx=True).astype(o_ref.dtype)


def _round_up(n, m):
    return ((n + m - 1) // m) * m


def _cdiv(a, b):
    return (a + b - 1) // b


def mlp_forward(x, params):
    """x: (B, 7) float32  ->  (B, 2) float32 (matches the PyTorch module)."""
    w1, b1, w2, b2, w3, b3 = params
    B = x.shape[0]

    # Batch on the lane axis.  Pick the tile so padding is at most ~LANE per
    # tile even when B is not a multiple of MAX_TILE_B.
    b128 = _round_up(B, LANE)
    n_tiles = _cdiv(b128, MAX_TILE_B)
    tile_b = _round_up(_cdiv(b128, n_tiles), LANE)
    b_pad = tile_b * n_tiles

    xt = x.T                                              # (7, B)
    if b_pad != B:
        xt = jnp.pad(xt, ((0, 0), (0, b_pad - B)))

    out_t = pl.pallas_call(
        mlp_kernel,
        out_shape=jax.ShapeDtypeStruct((2, b_pad), jnp.float32),
        grid=(n_tiles,),
        in_specs=[
            # Activations: tiled over the batch (lane) axis.
            pl.BlockSpec((7, tile_b), lambda i: (0, i)),
            # Weights / biases: constant index_map -> VMEM-resident across steps.
            pl.BlockSpec((32, 7), lambda i: (0, 0)),
            pl.BlockSpec((32, 1), lambda i: (0, 0)),
            pl.BlockSpec((64, 32), lambda i: (0, 0)),
            pl.BlockSpec((64, 1), lambda i: (0, 0)),
            pl.BlockSpec((2, 64), lambda i: (0, 0)),
            pl.BlockSpec((2, 1), lambda i: (0, 0)),
        ],
        out_specs=pl.BlockSpec((2, tile_b), lambda i: (0, i)),
        compiler_params=pltpu.CompilerParams(
            dimension_semantics=("parallel",),            # megacore on v7x
            vmem_limit_bytes=VMEM_LIMIT_BYTES,
        ),
    )(xt, w1, b1, w2, b2, w3, b3)

    return out_t[:, :B].T                                 # back to (B, 2)


def init_params(key):
    """Mirrors nn.Linear default init (U(-1/sqrt(fan_in), 1/sqrt(fan_in)))."""
    def linear(key, fan_in, fan_out):
        kw, kb = jax.random.split(key)
        bound = 1.0 / jnp.sqrt(float(fan_in))
        w = jax.random.uniform(kw, (fan_out, fan_in), jnp.float32, -bound, bound)
        b = jax.random.uniform(kb, (fan_out, 1), jnp.float32, -bound, bound)
        return w, b

    k1, k2, k3 = jax.random.split(key, 3)
    w1, b1 = linear(k1, 7, 32)     # (32, 7),  (32, 1)
    w2, b2 = linear(k2, 32, 64)    # (64, 32), (64, 1)
    w3, b3 = linear(k3, 64, 2)     # (2, 64),  (2, 1)   (kept (out, in) for MXU fc3)
    return (w1, b1, w2, b2, w3, b3)


if __name__ == "__main__":
    key = jax.random.PRNGKey(0)
    kx, kp = jax.random.split(key)

    batch = 8
    x = jax.random.normal(kx, (batch, 7), dtype=jnp.float32)
    params = init_params(kp)

    out = jax.block_until_ready(mlp_forward(x, params))

    # Plain-JAX reference for the same parameters.
    w1, b1, w2, b2, w3, b3 = params
    ref = jnp.maximum(x @ w1.T + b1[:, 0], 0.0)
    ref = jnp.maximum(ref @ w2.T + b2[:, 0], 0.0)
    ref = jax.nn.sigmoid(ref @ w3.T + b3[:, 0])

    assert out.shape == (batch, 2)
    # Tolerance loosened deliberately: approx=True EUP reciprocal contributes
    # up to ~2.5e-4 abs error on a sigmoid output.
    assert jnp.allclose(out, ref, atol=2e-3), "mismatch vs reference"

    print("KERNEL_OK")
</pallas_src>

<mosaic_0001>
module attributes {stable_mosaic.version = 11 : i64} {
  func.func @mlp_kernel(%arg0: i32, %arg1: memref<7x128xf32, #tpu.memory_space<vmem>>, %arg2: memref<32x7xf32, #tpu.memory_space<vmem>>, %arg3: memref<32x1xf32, #tpu.memory_space<vmem>>, %arg4: memref<64x32xf32, #tpu.memory_space<vmem>>, %arg5: memref<64x1xf32, #tpu.memory_space<vmem>>, %arg6: memref<2x64xf32, #tpu.memory_space<vmem>>, %arg7: memref<2x1xf32, #tpu.memory_space<vmem>>, %arg8: memref<2x128xf32, #tpu.memory_space<vmem>>) attributes {dimension_semantics = [#tpu.dimension_semantics<parallel>], iteration_bounds = array<i64: 1>, scalar_prefetch = 0 : i64, scratch_operands = 0 : i64, tpu.core_type = #tpu.core_type<tc>, window_params = [{transform_indices = @transform_0, window_bounds = array<i64: 7, 128>}, {pipeline_mode = #tpu.pipeline_mode<synchronous>, transform_indices = @transform_1, window_bounds = array<i64: 32, 7>}, {pipeline_mode = #tpu.pipeline_mode<synchronous>, transform_indices = @transform_2, window_bounds = array<i64: 32, 1>}, {pipeline_mode = #tpu.pipeline_mode<synchronous>, transform_indices = @transform_3, window_bounds = array<i64: 64, 32>}, {pipeline_mode = #tpu.pipeline_mode<synchronous>, transform_indices = @transform_4, window_bounds = array<i64: 64, 1>}, {pipeline_mode = #tpu.pipeline_mode<synchronous>, transform_indices = @transform_5, window_bounds = array<i64: 2, 64>}, {pipeline_mode = #tpu.pipeline_mode<synchronous>, transform_indices = @transform_6, window_bounds = array<i64: 2, 1>}, {transform_indices = @transform_7, window_bounds = array<i64: 2, 128>}]} {
    %c0 = arith.constant 0 : index
    %c0_0 = arith.constant 0 : index
    %0 = vector.load %arg1[%c0, %c0_0] : memref<7x128xf32, #tpu.memory_space<vmem>>, vector<7x128xf32>
    %c0_1 = arith.constant 0 : index
    %c0_2 = arith.constant 0 : index
    %1 = vector.load %arg2[%c0_1, %c0_2] : memref<32x7xf32, #tpu.memory_space<vmem>>, vector<32x7xf32>
    %cst = arith.constant dense<0.000000e+00> : vector<32x128xf32>
    %2 = tpu.matmul %1, %0, %cst {dimension_numbers = #tpu.dot_dimension_numbers<[1], [0], [0], [1], [0, 0, 1, 1], [], []>} : vector<32x7xf32>, vector<7x128xf32>, vector<32x128xf32> -> vector<32x128xf32>
    %c0_3 = arith.constant 0 : index
    %c0_4 = arith.constant 0 : index
    %3 = vector.load %arg3[%c0_3, %c0_4] : memref<32x1xf32, #tpu.memory_space<vmem>>, vector<32x1xf32>
    %4 = vector.broadcast %3 : vector<32x1xf32> to vector<32x128xf32>
    %5 = arith.addf %2, %4 : vector<32x128xf32>
    %cst_5 = arith.constant 0.000000e+00 : f32
    %6 = vector.broadcast %cst_5 : f32 to vector<32x128xf32>
    %7 = arith.maximumf %5, %6 : vector<32x128xf32>
    %c0_6 = arith.constant 0 : index
    %c0_7 = arith.constant 0 : index
    %8 = vector.load %arg4[%c0_6, %c0_7] : memref<64x32xf32, #tpu.memory_space<vmem>>, vector<64x32xf32>
    %cst_8 = arith.constant dense<0.000000e+00> : vector<64x128xf32>
    %9 = tpu.matmul %8, %7, %cst_8 {dimension_numbers = #tpu.dot_dimension_numbers<[1], [0], [0], [1], [0, 0, 1, 1], [], []>} : vector<64x32xf32>, vector<32x128xf32>, vector<64x128xf32> -> vector<64x128xf32>
    %c0_9 = arith.constant 0 : index
    %c0_10 = arith.constant 0 : index
    %10 = vector.load %arg5[%c0_9, %c0_10] : memref<64x1xf32, #tpu.memory_space<vmem>>, vector<64x1xf32>
    %11 = vector.broadcast %10 : vector<64x1xf32> to vector<64x128xf32>
    %12 = arith.addf %9, %11 : vector<64x128xf32>
    %cst_11 = arith.constant 0.000000e+00 : f32
    %13 = vector.broadcast %cst_11 : f32 to vector<64x128xf32>
    %14 = arith.maximumf %12, %13 : vector<64x128xf32>
    %c0_12 = arith.constant 0 : index
    %c0_13 = arith.constant 0 : index
    %15 = vector.load %arg6[%c0_12, %c0_13] : memref<2x64xf32, #tpu.memory_space<vmem>>, vector<2x64xf32>
    %cst_14 = arith.constant dense<0.000000e+00> : vector<2x128xf32>
    %16 = tpu.matmul %15, %14, %cst_14 {dimension_numbers = #tpu.dot_dimension_numbers<[1], [0], [0], [1], [0, 0, 1, 1], [], []>} : vector<2x64xf32>, vector<64x128xf32>, vector<2x128xf32> -> vector<2x128xf32>
    %c0_15 = arith.constant 0 : index
    %c0_16 = arith.constant 0 : index
    %17 = vector.load %arg7[%c0_15, %c0_16] : memref<2x1xf32, #tpu.memory_space<vmem>>, vector<2x1xf32>
    %18 = vector.broadcast %17 : vector<2x1xf32> to vector<2x128xf32>
    %19 = arith.addf %16, %18 : vector<2x128xf32>
    %cst_17 = arith.constant 0.000000e+00 : f32
    %20 = vector.broadcast %cst_17 : f32 to vector<2x128xf32>
    %21 = arith.subf %20, %19 : vector<2x128xf32>
    %22 = math.exp %21 : vector<2x128xf32>
    %cst_18 = arith.constant 1.000000e+00 : f32
    %23 = vector.broadcast %cst_18 : f32 to vector<2x128xf32>
    %24 = arith.addf %23, %22 : vector<2x128xf32>
    %25 = tpu.reciprocal %24 {approx = true} : vector<2x128xf32> -> vector<2x128xf32>
    %c0_19 = arith.constant 0 : index
    %c0_20 = arith.constant 0 : index
    %26 = vector.load %arg8[%c0_19, %c0_20] : memref<2x128xf32, #tpu.memory_space<vmem>>, vector<2x128xf32>
    tpu.vector_store %arg8[%c0_19, %c0_20], %25 {strides = array<i32>} : memref<2x128xf32, #tpu.memory_space<vmem>>, vector<2x128xf32>,
    return
  }
  func.func @transform_0(%arg0: i32) -> (i32, i32) {
    %c0_i32 = arith.constant 0 : i32
    %c0_i32_0 = arith.constant 0 : i32
    return %c0_i32, %arg0 : i32, i32
  }
  func.func @transform_1(%arg0: i32) -> (i32, i32) {
    %c0_i32 = arith.constant 0 : i32
    %c0_i32_0 = arith.constant 0 : i32
    %c0_i32_1 = arith.constant 0 : i32
    return %c0_i32, %c0_i32_0 : i32, i32
  }
  func.func @transform_2(%arg0: i32) -> (i32, i32) {
    %c0_i32 = arith.constant 0 : i32
    %c0_i32_0 = arith.constant 0 : i32
    %c0_i32_1 = arith.constant 0 : i32
    return %c0_i32, %c0_i32_0 : i32, i32
  }
  func.func @transform_3(%arg0: i32) -> (i32, i32) {
    %c0_i32 = arith.constant 0 : i32
    %c0_i32_0 = arith.constant 0 : i32
    %c0_i32_1 = arith.constant 0 : i32
    return %c0_i32, %c0_i32_0 : i32, i32
  }
  func.func @transform_4(%arg0: i32) -> (i32, i32) {
    %c0_i32 = arith.constant 0 : i32
    %c0_i32_0 = arith.constant 0 : i32
    %c0_i32_1 = arith.constant 0 : i32
    return %c0_i32, %c0_i32_0 : i32, i32
  }
  func.func @transform_5(%arg0: i32) -> (i32, i32) {
    %c0_i32 = arith.constant 0 : i32
    %c0_i32_0 = arith.constant 0 : i32
    %c0_i32_1 = arith.constant 0 : i32
    return %c0_i32, %c0_i32_0 : i32, i32
  }
  func.func @transform_6(%arg0: i32) -> (i32, i32) {
    %c0_i32 = arith.constant 0 : i32
    %c0_i32_0 = arith.constant 0 : i32
    %c0_i32_1 = arith.constant 0 : i32
    return %c0_i32, %c0_i32_0 : i32, i32
  }
  func.func @transform_7(%arg0: i32) -> (i32, i32) {
    %c0_i32 = arith.constant 0 : i32
    %c0_i32_0 = arith.constant 0 : i32
    return %c0_i32, %arg0 : i32, i32
  }
}

</mosaic_0001>

<bundles_post_ra>
// kernel: tpu_custom_call.1
= control target key start
LH: loop header
LB: loop body
LE: loop exit
PB: predicated region body
PF: predicated region fallthrough
CT: control target
= control target key end

     0   :  { %vm69_vm0 = vcmask 1046528   ;;  %vm56_vm1 = vcmask 56320   ;;  %v576_v5 = vmov 0   ;;  %s716_s0 = inlined_call_operand.vmem [shape: f32[7,128], index: 0, kind: input, shape index: {}]   ;;  %s717_s1 = inlined_call_operand.vmem [shape: f32[32,7], index: 1, kind: input, shape index: {}]   ;;  %s718_s2 = inlined_call_operand.vmem [shape: f32[32,1], index: 2, kind: input, shape index: {}]   ;;  %s719_s3 = inlined_call_operand.vmem [shape: f32[64,32], index: 3, kind: input, shape index: {}]   ;;  %s720_s4 = inlined_call_operand.vmem [shape: f32[64,1], index: 4, kind: input, shape index: {}]   ;;  %s721_s5 = inlined_call_operand.vmem [shape: f32[2,64], index: 5, kind: input, shape index: {}]   ;;  %s722_s6 = inlined_call_operand.vmem [shape: f32[2,1], index: 6, kind: input, shape index: {}]   ;;  %s723_s7 = inlined_call_operand.hbm [shape: f32[2,128], index: 7, kind: output, shape index: {}]  }
   0x1   :  { %v27_v0 = vld [vmem:[%s716_s0] sm:$0x7f]  ;;  %v29_v2 = vld [vmem:[%s717_s1 + $0x8] sm:$0xff]  ;;  %v30_v3 = vld [vmem:[%s717_s1 + $0x10] sm:$0xff]  ;;  %548 = vset.pattern.permute.xlu0 %v576_v5  ;;  %549 = vset.pattern.permute.xlu1 %v576_v5 }
   0x2   :  { %v28_v1 = vld [vmem:[%s717_s1] sm:$0xff]  ;;  %497 = vmatprep.subr.msk.mxu0 %vm69_vm0, %v27_v0  ;;  %v35_v4 = vld [vmem:[%s718_s2 + $0x18] sm:$0xff]  ;;  %v33_v6 = vld [vmem:[%s718_s2 + $0x8] sm:$0xff] }
   0x3   :  { %499 = vmatprep.mubr.msk.f32.mxu0 %vm56_vm1, %v28_v1  ;;  %498 = vmatpush3.msk.msra.mxu0 %vm69_vm0, %v27_v0  ;;  %v31_v7 = vld [vmem:[%s717_s1 + $0x18] sm:$0xff]  ;;  %v34_v8 = vld [vmem:[%s718_s2 + $0x10] sm:$0xff]  ;;  %v32_v9 = vld [vmem:[%s718_s2] sm:$0xff] }
   0x4   :  { %500 = vmatmul.mubr.msk.f32.vlgmr.msra.gmra.mxu0 %vm56_vm1, %v29_v2  ;;  %53 = vperm.xlu0 %548, %v35_v4  }
   0x5   :  { %502 = vmatprep.mubr.msk.f32.mxu0 %vm56_vm1, %v30_v3  ;;  %43 = vperm.xlu1 %549, %v33_v6  }
   0x6   :  { %12 = vsyncpa [#allocation3], 0  ;;  %v177_v10 = vld [vmem:[%s720_s4 + $0x38] sm:$0xff]  ;;  %v176_v11 = vld [vmem:[%s720_s4 + $0x30] sm:$0xff]  ;;  %vm218_vm2 = vcmask 261120   ;;  %v577_v43 = vmov 0.0  }
   0x7   :  { %v175_v12 = vld [vmem:[%s720_s4 + $0x28] sm:$0xff]  ;;  %v174_v13 = vld [vmem:[%s720_s4 + $0x20] sm:$0xff]  ;;  %v173_v14 = vld [vmem:[%s720_s4 + $0x18] sm:$0xff]  ;;  %525 = vmatprep.subr.mxu0 %v577_v43  ;;  %vm578_vm3 = vmmov 0   ;;  %vm363_vm4 = vcmask 523264   ;;  %s579_s23 = smov [#allocation2]  }
   0x8   :  { %503 = vmatmul.mubr.msk.f32.gmra.mxu0 %vm56_vm1, %v31_v7  ;;  %48 = vperm.xlu0 %548, %v34_v8   ;;  %v172_v15 = vld [vmem:[%s720_s4 + $0x10] sm:$0xff]  ;;  %v171_v16 = vld [vmem:[%s720_s4 + $0x8] sm:$0xff]  ;;  %v170_v17 = vld [vmem:[%s720_s4] sm:$0xff]  ;;  %s449_s24 = sshll.u32 %s579_s23, 4  ;;  %s450_s24 = int_to_ptr.vmem [resolvable:$true] %s449_s24 }
   0x9   :  { %38 = vperm.xlu1 %549, %v32_v9   ;;  %v357_v18 = vld [vmem:[%s722_s6] sm:$0x3]  ;;  %v163_v36 = vld [vmem:[%s719_s3 + $0x8] sm:$0xff]  ;;  %v164_v37 = vld [vmem:[%s719_s3 + $0x10] sm:$0xff]  ;;  %541 = vmatprep.mubr.msk.f32.mxu0 %vm578_vm3, %v577_v43  ;;  %p559_p1 = scmp.lt.s32.totalorder %s450_s24, %s450_s24 }
   0xa   :  { %v162_v19 = vld [vmem:[%s719_s3] sm:$0xff]  ;;  %v165_v38 = vld [vmem:[%s719_s3 + $0x18] sm:$0xff]  ;;  %v167_v40 = vld [vmem:[%s719_s3 + $0x28] sm:$0xff] }
   0xb   :  { %513 = vmatprep.mubr.msk.f32.mxu1 %vm218_vm2, %v162_v19  ;;  %v166_v39 = vld [vmem:[%s719_s3 + $0x20] sm:$0xff]  ;;  %v168_v41 = vld [vmem:[%s719_s3 + $0x30] sm:$0xff]  ;;  %v169_v42 = vld [vmem:[%s719_s3 + $0x38] sm:$0xff] }
   0xc   :  { %215 = vperm.xlu0 %548, %v177_v10  }
   0xd   :  { %210 = vperm.xlu1 %549, %v176_v11  }
  0x10   :  { %205 = vperm.xlu0 %548, %v175_v12   ;;  %v356_v12 = vld [vmem:[%s721_s5] sm:$0x3]  ;;  %s554_s5 = scalar_lea.vmem %s450_s24, 32 }
  0x11   :  { %200 = vperm.xlu1 %549, %v174_v13   ;;  %p555_p0 = scmp.ne.s32.totalorder %s450_s24, %s554_s5  ;;  %p560_p2 = scmp.lt.s32.totalorder %s554_s5, %s554_s5 }
  0x13   :  { %p561_p3 = por %p560_p2, %p559_p1 }
  0x14   :  { %195 = vperm.xlu0 %548, %v173_v14  }
  0x15   :  { %190 = vperm.xlu1 %549, %v172_v15   ;;  %p562_p4 = pnand %p561_p3, %p555_p0 }
  0x18   :  { %185 = vperm.xlu0 %548, %v171_v16  }
  0x19   :  { %180 = vperm.xlu1 %549, %v170_v17  }
  0x1c   :  { %360 = vperm.xlu0 %548, %v357_v18  }
  0x7f   :  { %v54_v20 = vpop.permute.xlu0 %53 }
  0x80   :  { %v44_v22 = vpop.permute.xlu1 %43 }
  0x83   :  { %v49_v26 = vpop.permute.xlu0 %48 }
  0x84   :  { %v39_v31 = vpop.permute.xlu1 %38 }
  0x87   :  { %v216_v46 = vpop.permute.xlu0 %215 }
  0x88   :  { %v211_v48 = vpop.permute.xlu1 %210 }
  0x8b   :  { %v206_v51 = vpop.permute.xlu0 %205 }
  0x8c   :  { %v201_v53 = vpop.permute.xlu1 %200 }
  0x8f   :  { %v196_v60 = vpop.permute.xlu0 %195 }
  0x90   :  { %v191_v63 = vpop.permute.xlu1 %190 }
  0x93   :  { %v186_v4 = vpop.permute.xlu0 %185 }
  0x94   :  { %v181_v7 = vpop.permute.xlu1 %180 }
  0x97   :  { %v361_v13 = vpop.permute.xlu0 %360 }
  0xc4   :  { %v501_v21 = vpop.f32.mrf.mxu0 }
  0xc5   :  { %v145_v28 = vadd.f32 %v501_v21, %v44_v22 }
  0xc6   :  { %v139_v23 = vpop.f32.mrf.mxu0 }
  0xc7   :  { %v140_v32 = vadd.f32 %v139_v23, %v39_v31  ;;  %v159_v34 = vmax.f32 %v145_v28, 0.0 }
  0xc8   :  { %v504_v24 = vpop.f32.mrf.mxu0 }
  0xc9   :  { %v155_v25 = vadd.f32 %v504_v24, %v54_v20  ;;  %v158_v35 = vmax.f32 %v140_v32, 0.0 }
  0xca   :  { %v149_v27 = vpop.f32.mrf.mxu0 }
  0xcb   :  { %v161_v29 = vmax.f32 %v155_v25, 0.0  ;;  %v150_v30 = vadd.f32 %v149_v27, %v49_v26 }
  0xcd   :  { %v160_v33 = vmax.f32 %v150_v30, 0.0  ;;  %505 = vmatprep.subr.mxu1 %v161_v29 }
  0xce   :  { %506 = vmatpush3.msra.mxu1 %v161_v29 }
  0xcf   :  { %507 = vmatprep.subr.mxu1 %v160_v33 }
  0xd0   :  { %508 = vmatpush3.msra.mxu1 %v160_v33 }
  0xd1   :  { %509 = vmatprep.subr.mxu1 %v159_v34 }
  0xd2   :  { %510 = vmatpush3.msra.mxu1 %v159_v34 }
  0xd3   :  { %511 = vmatprep.subr.mxu1 %v158_v35 }
  0xd4   :  { %512 = vmatpush3.msra.mxu1 %v158_v35 }
  0xd5   :  { %514 = vmatmul.mubr.msk.f32.vlgmr.msra.gmra.mxu1 %vm218_vm2, %v163_v36 }
  0xd6   :  { %516 = vmatprep.mubr.msk.f32.mxu1 %vm218_vm2, %v164_v37 }
  0xd9   :  { %517 = vmatmul.mubr.msk.f32.gmra.mxu1 %vm218_vm2, %v165_v38 }
  0xda   :  { %519 = vmatprep.mubr.msk.f32.mxu1 %vm218_vm2, %v166_v39 }
  0xdd   :  { %520 = vmatmul.mubr.msk.f32.gmra.mxu1 %vm218_vm2, %v167_v40 }
  0xde   :  { %522 = vmatprep.mubr.msk.f32.mxu1 %vm218_vm2, %v168_v41 }
  0xe1   :  { %523 = vmatmul.mubr.msk.f32.gmra.mxu1 %vm218_vm2, %v169_v42 }
 0x195   :  { %v515_v44 = vpop.f32.mrf.mxu1 }
 0x196   :  { %v315_v5 = vadd.f32 %v515_v44, %v186_v4 }
 0x197   :  { %v309_v45 = vpop.f32.mrf.mxu1 }
 0x198   :  { %v310_v8 = vadd.f32 %v309_v45, %v181_v7  ;;  %v349_v10 = vmax.f32 %v315_v5, 0.0 }
 0x199   :  { %v518_v47 = vpop.f32.mrf.mxu1 }
 0x19a   :  { %v325_v0 = vadd.f32 %v518_v47, %v196_v60  ;;  %v348_v11 = vmax.f32 %v310_v8, 0.0 }
 0x19b   :  { %v319_v49 = vpop.f32.mrf.mxu1 }
 0x19c   :  { %v320_v2 = vadd.f32 %v319_v49, %v191_v63  ;;  %v351_v6 = vmax.f32 %v325_v0, 0.0 }
 0x19d   :  { %v521_v50 = vpop.f32.mrf.mxu1 }
 0x19e   :  { %v335_v57 = vadd.f32 %v521_v50, %v206_v51  ;;  %v350_v9 = vmax.f32 %v320_v2, 0.0 }
 0x19f   :  { %v329_v52 = vpop.f32.mrf.mxu1 }
 0x1a0   :  { %v330_v61 = vadd.f32 %v329_v52, %v201_v53  ;;  %v353_v1 = vmax.f32 %v335_v57, 0.0 }
 0x1a1   :  { %v524_v54 = vpop.f32.mrf.mxu1 }
 0x1a2   :  { %v345_v55 = vadd.f32 %v524_v54, %v216_v46  ;;  %v352_v3 = vmax.f32 %v330_v61, 0.0 }
 0x1a3   :  { %v339_v56 = vpop.f32.mrf.mxu1 }
 0x1a4   :  { %v355_v58 = vmax.f32 %v345_v55, 0.0  ;;  %v340_v59 = vadd.f32 %v339_v56, %v211_v48 }
 0x1a6   :  { %v354_v62 = vmax.f32 %v340_v59, 0.0  ;;  %526 = vmatpush3.msra.mxu0 %v355_v58 }
 0x1a7   :  { %527 = vmatprep.subr.mxu0 %v577_v43 }
 0x1a8   :  { %528 = vmatpush3.msra.mxu0 %v354_v62 }
 0x1a9   :  { %529 = vmatprep.subr.mxu0 %v577_v43 }
 0x1aa   :  { %530 = vmatpush3.msra.mxu0 %v353_v1 }
 0x1ab   :  { %531 = vmatprep.subr.mxu0 %v577_v43 }
 0x1ac   :  { %532 = vmatpush3.msra.mxu0 %v352_v3 }
 0x1ad   :  { %533 = vmatprep.subr.mxu0 %v577_v43 }
 0x1ae   :  { %534 = vmatpush3.msra.mxu0 %v351_v6 }
 0x1af   :  { %535 = vmatprep.subr.mxu0 %v577_v43 }
 0x1b0   :  { %536 = vmatpush3.msra.mxu0 %v350_v9 }
 0x1b1   :  { %537 = vmatprep.subr.mxu0 %v577_v43 }
 0x1b2   :  { %538 = vmatpush3.msra.mxu0 %v349_v10 }
 0x1b3   :  { %539 = vmatprep.subr.mxu0 %v577_v43 }
 0x1b4   :  { %540 = vmatpush3.msra.mxu0 %v348_v11 }
 0x1b5   :  { %542 = vmatmul.mubr.msk.f32.vlgmr.msra.gmra.mxu0 %vm363_vm4, %v356_v12 }
 0x275   :  { %v433_v14 = vpop.f32.mrf.mxu0 }
 0x276   :  { %v434_v15 = vadd.f32 %v433_v14, %v361_v13 }
 0x277   :  { %v543_v16 = vpop.f32.mrf.mxu0 }
 0x278   :  { %v437_v17 = vsub.f32 0.0, %v434_v15 }
 0x27a   :  { %v438_v18 = vmul.f32 1.442695, %v437_v17 }
 0x27c   :  { %550 = vpow2.f32 %v438_v18 }
 0x289   :  { %v551_v19 = vpop.eup %550 }
 0x28a   :  { %v440_v20 = vadd.f32 1.0, %v551_v19 }
 0x28c   :  { %552 = vrcp.f32 %v440_v20 }
 0x299   :  { %v553_v21 = vpop.eup %552 }
 0x29a   :  { %442 = vst [vmem:[#allocation2] sm:$0x3] %v553_v21 }
 0x29b   :  { %565 = shalt.err (!%p562_p4)
}
 0x29c   :  { %452 = dma.vmem_to_hbm [thread:$0]  %s450_s24, 32, %s723_s7, [#allocation3]  }
 0x29d   :  { %574 = dma.done.wait [#allocation3], 32  }
 0x29e   :  { %575 = vsyncadd [#allocation3], 4294967264 }
 0x29f   :  { %456 = vsyncpa [#allocation3], 1 }

</bundles_post_ra>
